<compile_context>
chip_gen: v6e
topology: v6e:2x2x1
jax: 0.10.0
libtpu: 0.0.40
codegen_flags: <defaults>
</compile_context>

<pallas_src>
import functools

import jax
import jax.numpy as jnp
from jax.experimental import pallas as pl
from jax.experimental.pallas import tpu as pltpu

IN_F, HID_F, OUT_F = 100, 200, 10          # logical (PyTorch) sizes
IN_P, HID_P, OUT_P = 128, 256, 128         # lane-padded sizes
NEG_PAD = -1e30                            # finite "minus infinity" for padded logits
MAX_TB = 2048                              # rows per grid step (<8 MiB VMEM at this size)
ROW_ALIGN = 16                             # bf16 sublane-pack-friendly row granularity


def _round_up(n, m):
    return ((n + m - 1) // m) * m


def _mlp_kernel(x_ref, w1_ref, b1_ref, w2_ref, b2_ref, o_ref):
    # Fused: matmul1 + bias + ReLU + matmul2 + bias + softmax on padded dense tiles.
    x = x_ref[...]                                                       # [TB, 128] bf16
    h = jnp.dot(x, w1_ref[...], preferred_element_type=jnp.float32)      # [TB, 256] f32 acc
    h = jnp.maximum(h + b1_ref[...], 0.0)                                # bias + ReLU (f32)
    logits = jnp.dot(h.astype(jnp.bfloat16), w2_ref[...],
                     preferred_element_type=jnp.float32)                 # [TB, 128] f32 acc
    logits = logits + b2_ref[...]                                        # pad lanes -> -1e30
    m = jnp.max(logits, axis=-1, keepdims=True)
    e = jnp.exp(logits - m)                                              # pad lanes -> 0
    denom = jnp.sum(e, axis=-1, keepdims=True)
    o_ref[...] = e / denom                                               # exact divide (f32)


def pad_params(w1, b1, w2, b2):
    """Pad params once at init time. Weights -> bf16 (MXU operands); biases stay f32.

    NOTE: w2_p pad columns MUST be zero and b2_p pad lanes MUST be NEG_PAD -- together they
    make the padded softmax lanes exactly zero without any masking.
    """
    w1_p = jnp.pad(w1, ((0, IN_P - IN_F), (0, HID_P - HID_F))).astype(jnp.bfloat16)
    b1_p = jnp.pad(b1, ((0, 0), (0, HID_P - HID_F))).astype(jnp.float32)
    w2_p = jnp.pad(w2, ((0, HID_P - HID_F), (0, OUT_P - OUT_F))).astype(jnp.bfloat16)
    b2_p = jnp.pad(b2, ((0, 0), (0, OUT_P - OUT_F)),
                   constant_values=NEG_PAD).astype(jnp.float32)
    return w1_p, b1_p, w2_p, b2_p


def pad_input(x):
    """Pad/cast the activation ONCE upstream (not per forward call): [B,100]f32 -> [Bp,128]bf16."""
    B = x.shape[0]
    Bp = _round_up(B, ROW_ALIGN)
    return jnp.pad(x, ((0, Bp - B), (0, IN_P - IN_F))).astype(jnp.bfloat16)


def _pick_tile(Bp):
    """Batch-tile selection (trace-time, static)."""
    if Bp <= 256:
        return Bp                                     # single step; batch too small to split
    if Bp <= MAX_TB:
        return _round_up(pl.cdiv(Bp, 2), ROW_ALIGN)   # >=2 steps so v7x's 2nd TC has work
    return MAX_TB


@functools.partial(jax.jit, static_argnames=())
def tiny_model_forward(x_p, w1_p, b1_p, w2_p, b2_p):
    """x_p: [Bp, 128] bf16 (pre-padded via pad_input); params pre-padded via pad_params.

    Returns the padded [Bp, 128] f32 softmax slab; caller slices [:B, :10] once.
    """
    Bp = x_p.shape[0]
    TB = _pick_tile(Bp)
    grid = (pl.cdiv(Bp, TB),)          # ragged last tile instead of over-padding the batch

    flops = 2 * Bp * (IN_P * HID_P + HID_P * OUT_P)
    bytes_accessed = (2 * (Bp * IN_P + IN_P * HID_P + HID_P * OUT_P)   # bf16 x + weights
                      + 4 * (HID_P + OUT_P + Bp * OUT_P))              # f32 biases + output

    return pl.pallas_call(
        _mlp_kernel,
        out_shape=jax.ShapeDtypeStruct((Bp, OUT_P), jnp.float32),
        grid=grid,
        in_specs=[
            pl.BlockSpec((TB, IN_P), lambda i: (i, 0)),        # x tile streams over batch
            pl.BlockSpec((IN_P, HID_P), lambda i: (0, 0)),     # weights stay VMEM-resident
            pl.BlockSpec((1, HID_P), lambda i: (0, 0)),
            pl.BlockSpec((HID_P, OUT_P), lambda i: (0, 0)),
            pl.BlockSpec((1, OUT_P), lambda i: (0, 0)),
        ],
        out_specs=pl.BlockSpec((TB, OUT_P), lambda i: (i, 0)), # lane-dense store
        compiler_params=pltpu.CompilerParams(
            dimension_semantics=("parallel",),                 # megacore sharding on v7x
        ),
        cost_estimate=pl.CostEstimate(
            flops=flops,
            transcendentals=Bp * OUT_P,
            bytes_accessed=bytes_accessed,
        ),
    )(x_p, w1_p, b1_p, w2_p, b2_p)


def _init_params(key):
    # Deterministic init mimicking torch.nn.Linear default (uniform +/- 1/sqrt(fan_in)).
    k1, k2, k3, k4 = jax.random.split(key, 4)
    bound1 = 1.0 / jnp.sqrt(IN_F)
    bound2 = 1.0 / jnp.sqrt(HID_F)
    w1 = jax.random.uniform(k1, (IN_F, HID_F), jnp.float32, -bound1, bound1)
    b1 = jax.random.uniform(k2, (1, HID_F), jnp.float32, -bound1, bound1)
    w2 = jax.random.uniform(k3, (HID_F, OUT_F), jnp.float32, -bound2, bound2)
    b2 = jax.random.uniform(k4, (1, OUT_F), jnp.float32, -bound2, bound2)
    return w1, b1, w2, b2


if __name__ == "__main__":
    key = jax.random.PRNGKey(0)
    k_x, k_p = jax.random.split(key)
    B = 8
    x = jax.random.normal(k_x, (B, IN_F), jnp.float32)
    w1, b1, w2, b2 = _init_params(k_p)

    # Pad once, upstream (init time for params, producer side for the activation).
    w1_p, b1_p, w2_p, b2_p = pad_params(w1, b1, w2, b2)
    x_p = pad_input(x)

    out_padded = tiny_model_forward(x_p, w1_p, b1_p, w2_p, b2_p)
    out_padded = jax.block_until_ready(out_padded)
    out = out_padded[:B, :OUT_F]                      # slice off padding once

    # Reference 1: bf16-operand-matched reference (same dtype plan as the kernel) -> tight.
    h_m = jnp.dot(x.astype(jnp.bfloat16), w1.astype(jnp.bfloat16),
                  preferred_element_type=jnp.float32) + b1
    h_m = jnp.maximum(h_m, 0.0)
    logits_m = jnp.dot(h_m.astype(jnp.bfloat16), w2.astype(jnp.bfloat16),
                       preferred_element_type=jnp.float32) + b2
    ref_matched = jax.nn.softmax(logits_m, axis=-1)

    # Reference 2: pure-f32 reference (PyTorch semantics) -> loose (bf16 operand rounding).
    h_ref = jnp.maximum(x @ w1 + b1, 0.0)
    ref_f32 = jax.nn.softmax(h_ref @ w2 + b2, axis=-1)

    assert out.shape == (B, OUT_F)
    assert jnp.allclose(out, ref_matched, atol=5e-4, rtol=5e-4)
    assert jnp.allclose(out, ref_f32, atol=3e-2, rtol=3e-2)
    assert jnp.allclose(jnp.sum(out, axis=-1), 1.0, atol=1e-4)

    print("KERNEL_OK")
</pallas_src>

<mosaic_0001>
module attributes {stable_mosaic.version = 11 : i64} {
  func.func @_mlp_kernel(%arg0: i32, %arg1: memref<16x128xbf16, #tpu.memory_space<vmem>>, %arg2: memref<128x256xbf16, #tpu.memory_space<vmem>>, %arg3: memref<1x256xf32, #tpu.memory_space<vmem>>, %arg4: memref<256x128xbf16, #tpu.memory_space<vmem>>, %arg5: memref<1x128xf32, #tpu.memory_space<vmem>>, %arg6: memref<16x128xf32, #tpu.memory_space<vmem>>) attributes {dimension_semantics = [#tpu.dimension_semantics<parallel>], iteration_bounds = array<i64: 1>, scalar_prefetch = 0 : i64, scratch_operands = 0 : i64, tpu.core_type = #tpu.core_type<tc>, window_params = [{transform_indices = @transform_0, window_bounds = array<i64: 16, 128>}, {pipeline_mode = #tpu.pipeline_mode<synchronous>, transform_indices = @transform_1, window_bounds = array<i64: 128, 256>}, {pipeline_mode = #tpu.pipeline_mode<synchronous>, transform_indices = @transform_2, window_bounds = array<i64: 1, 256>}, {pipeline_mode = #tpu.pipeline_mode<synchronous>, transform_indices = @transform_3, window_bounds = array<i64: 256, 128>}, {pipeline_mode = #tpu.pipeline_mode<synchronous>, transform_indices = @transform_4, window_bounds = array<i64: 1, 128>}, {transform_indices = @transform_5, window_bounds = array<i64: 16, 128>}]} {
    %c0 = arith.constant 0 : index
    %c0_0 = arith.constant 0 : index
    %0 = vector.load %arg1[%c0, %c0_0] : memref<16x128xbf16, #tpu.memory_space<vmem>>, vector<16x128xbf16>
    %c0_1 = arith.constant 0 : index
    %c0_2 = arith.constant 0 : index
    %1 = vector.load %arg2[%c0_1, %c0_2] : memref<128x256xbf16, #tpu.memory_space<vmem>>, vector<128x256xbf16>
    %cst = arith.constant dense<0.000000e+00> : vector<16x256xf32>
    %2 = tpu.matmul %0, %1, %cst {dimension_numbers = #tpu.dot_dimension_numbers<[1], [0], [0], [1], [0, 0, 1, 1], [], []>} : vector<16x128xbf16>, vector<128x256xbf16>, vector<16x256xf32> -> vector<16x256xf32>
    %c0_3 = arith.constant 0 : index
    %c0_4 = arith.constant 0 : index
    %3 = vector.load %arg3[%c0_3, %c0_4] : memref<1x256xf32, #tpu.memory_space<vmem>>, vector<1x256xf32>
    %4 = vector.broadcast %3 : vector<1x256xf32> to vector<16x256xf32>
    %5 = arith.addf %2, %4 : vector<16x256xf32>
    %cst_5 = arith.constant 0.000000e+00 : f32
    %6 = vector.broadcast %cst_5 : f32 to vector<16x256xf32>
    %7 = arith.maximumf %5, %6 : vector<16x256xf32>
    %8 = arith.truncf %7 : vector<16x256xf32> to vector<16x256xbf16>
    %c0_6 = arith.constant 0 : index
    %c0_7 = arith.constant 0 : index
    %9 = vector.load %arg4[%c0_6, %c0_7] : memref<256x128xbf16, #tpu.memory_space<vmem>>, vector<256x128xbf16>
    %cst_8 = arith.constant dense<0.000000e+00> : vector<16x128xf32>
    %10 = tpu.matmul %8, %9, %cst_8 {dimension_numbers = #tpu.dot_dimension_numbers<[1], [0], [0], [1], [0, 0, 1, 1], [], []>} : vector<16x256xbf16>, vector<256x128xbf16>, vector<16x128xf32> -> vector<16x128xf32>
    %c0_9 = arith.constant 0 : index
    %c0_10 = arith.constant 0 : index
    %11 = vector.load %arg5[%c0_9, %c0_10] : memref<1x128xf32, #tpu.memory_space<vmem>>, vector<1x128xf32>
    %12 = vector.broadcast %11 : vector<1x128xf32> to vector<16x128xf32>
    %13 = arith.addf %10, %12 : vector<16x128xf32>
    %cst_11 = arith.constant dense<0xFF800000> : vector<16xf32>
    %14 = vector.multi_reduction <maximumf>, %13, %cst_11 [1] : vector<16x128xf32> to vector<16xf32>
    %15 = vector.shape_cast %14 : vector<16xf32> to vector<16x1xf32>
    %16 = vector.broadcast %15 : vector<16x1xf32> to vector<16x128xf32>
    %17 = arith.subf %13, %16 : vector<16x128xf32>
    %18 = math.exp %17 : vector<16x128xf32>
    %cst_12 = arith.constant dense<0.000000e+00> : vector<16xf32>
    %19 = vector.multi_reduction <add>, %18, %cst_12 [1] : vector<16x128xf32> to vector<16xf32>
    %20 = vector.shape_cast %19 : vector<16xf32> to vector<16x1xf32>
    %21 = vector.broadcast %20 : vector<16x1xf32> to vector<16x128xf32>
    %22 = arith.divf %18, %21 : vector<16x128xf32>
    %c0_13 = arith.constant 0 : index
    %c0_14 = arith.constant 0 : index
    %23 = vector.load %arg6[%c0_13, %c0_14] : memref<16x128xf32, #tpu.memory_space<vmem>>, vector<16x128xf32>
    tpu.vector_store %arg6[%c0_13, %c0_14], %22 {strides = array<i32>} : memref<16x128xf32, #tpu.memory_space<vmem>>, vector<16x128xf32>,
    return
  }
  func.func @transform_0(%arg0: i32) -> (i32, i32) {
    %c0_i32 = arith.constant 0 : i32
    %c0_i32_0 = arith.constant 0 : i32
    return %arg0, %c0_i32 : i32, i32
  }
  func.func @transform_1(%arg0: i32) -> (i32, i32) {
    %c0_i32 = arith.constant 0 : i32
    %c0_i32_0 = arith.constant 0 : i32
    %c0_i32_1 = arith.constant 0 : i32
    return %c0_i32, %c0_i32_0 : i32, i32
  }
  func.func @transform_2(%arg0: i32) -> (i32, i32) {
    %c0_i32 = arith.constant 0 : i32
    %c0_i32_0 = arith.constant 0 : i32
    %c0_i32_1 = arith.constant 0 : i32
    return %c0_i32, %c0_i32_0 : i32, i32
  }
  func.func @transform_3(%arg0: i32) -> (i32, i32) {
    %c0_i32 = arith.constant 0 : i32
    %c0_i32_0 = arith.constant 0 : i32
    %c0_i32_1 = arith.constant 0 : i32
    return %c0_i32, %c0_i32_0 : i32, i32
  }
  func.func @transform_4(%arg0: i32) -> (i32, i32) {
    %c0_i32 = arith.constant 0 : i32
    %c0_i32_0 = arith.constant 0 : i32
    %c0_i32_1 = arith.constant 0 : i32
    return %c0_i32, %c0_i32_0 : i32, i32
  }
  func.func @transform_5(%arg0: i32) -> (i32, i32) {
    %c0_i32 = arith.constant 0 : i32
    %c0_i32_0 = arith.constant 0 : i32
    return %arg0, %c0_i32 : i32, i32
  }
}

</mosaic_0001>

<bundles_post_ra>
// kernel: tiny_model_forward.1
= control target key start
LH: loop header
LB: loop body
LE: loop exit
PB: predicated region body
PF: predicated region fallthrough
CT: control target
= control target key end

     0   :  { %10 = vsyncpa [#allocation3], 0  ;;  %s705_s0 = inlined_call_operand.hbm [shape: bf16[16,128], index: 0, kind: input, shape index: {}]   ;;  %s706_s1 = inlined_call_operand.hbm [shape: bf16[128,256], index: 1, kind: input, shape index: {}]   ;;  %s707_s2 = inlined_call_operand.vmem [shape: f32[1,256], index: 2, kind: input, shape index: {}]   ;;  %s708_s3 = inlined_call_operand.hbm [shape: bf16[256,128], index: 3, kind: input, shape index: {}]   ;;  %s709_s4 = inlined_call_operand.vmem [shape: f32[1,128], index: 4, kind: input, shape index: {}]   ;;  %s710_s5 = inlined_call_operand.hbm [shape: f32[16,128], index: 5, kind: output, shape index: {}]  }
   0x1   :  { %11 = vsyncpa [#allocation6], 0 }
   0x2   :  { %12 = vsyncpa [#allocation4], 0  ;;  %s642_s18 = smov [#allocation5]  }
   0x3   :  { %s30_s19 = sshll.u32 %s642_s18, 4  ;;  %s31_s19 = int_to_ptr.vmem [resolvable:$true] %s30_s19 }
   0x4   :  { %s564_s20 = scalar_lea.vmem %s31_s19, 2048  ;;  %p569_p1 = scmp.lt.s32.totalorder %s31_s19, %s31_s19 }
   0x5   :  { %p565_p0 = scmp.ne.s32.totalorder %s31_s19, %s564_s20  ;;  %p570_p2 = scmp.lt.s32.totalorder %s564_s20, %s564_s20 }
   0x7   :  { %p571_p3 = por %p570_p2, %p569_p1 }
   0x9   :  { %p572_p4 = pnand %p571_p3, %p565_p0 }
   0xb   :  { %575 = shalt.err (!%p572_p4)
}
   0xc   :  { %s643_s21 = smov 128   ;;  %s644_s22 = smov 8  }
   0xd   :  { %36 = dma.hbm_to_vmem [thread:$0]  %s706_s1, 2048, %s31_s19, [#allocation6], %s643_s21, %s643_s21, %s644_s22  }
   0xe   :  { %s645_s25 = smov [#allocation2]  }
   0xf   :  { %s18_s26 = sshll.u32 %s645_s25, 4  ;;  %s19_s26 = int_to_ptr.vmem [resolvable:$true] %s18_s26 }
  0x10   :  { %s584_s27 = scalar_lea.vmem %s19_s26, 128  ;;  %p589_p6 = scmp.lt.s32.totalorder %s19_s26, %s19_s26 }
  0x11   :  { %p585_p5 = scmp.ne.s32.totalorder %s19_s26, %s584_s27  ;;  %p590_p7 = scmp.lt.s32.totalorder %s584_s27, %s584_s27 }
  0x13   :  { %p591_p8 = por %p590_p7, %p589_p6 }
  0x15   :  { %p592_p9 = pnand %p591_p8, %p585_p5 }
  0x17   :  { %595 = shalt.err (!%p592_p9)
}
  0x18   :  { %s646_s28 = smov 64   ;;  %s647_s29 = smov 4  }
  0x19   :  { %24 = dma.hbm_to_vmem [thread:$0]  %s705_s0, 128, %s19_s26, [#allocation3], %s646_s28, %s646_s28, %s647_s29  }
  0x1a   :  { %s648_s7 = smov [#allocation7]  }
  0x1b   :  { %s44_s8 = sshll.u32 %s648_s7, 4  ;;  %s45_s8 = int_to_ptr.vmem [resolvable:$true] %s44_s8 }
  0x1c   :  { %s604_s1 = scalar_lea.vmem %s45_s8, 2048  ;;  %p609_p11 = scmp.lt.s32.totalorder %s45_s8, %s45_s8 }
  0x1d   :  { %p605_p10 = scmp.ne.s32.totalorder %s45_s8, %s604_s1  ;;  %p610_p12 = scmp.lt.s32.totalorder %s604_s1, %s604_s1 }
  0x1f   :  { %p611_p13 = por %p610_p12, %p609_p11 }
  0x21   :  { %p612_p0 = pnand %p611_p13, %p605_p10 }
  0x23   :  { %615 = shalt.err (!%p612_p0)
}
  0x24   :  { %50 = dma.hbm_to_vmem [thread:$0]  %s708_s3, 2048, %s45_s8, [#allocation6], %s646_s28, %s646_s28, %s647_s29  }
  0x25   :  { %636 = dma.done.wait [#allocation3], 128  }
  0x26   :  { %637 = vsyncadd [#allocation3], 4294967168 }
  0x27   :  { %638 = dma.done.wait [#allocation6], 4096  }
  0x28   :  { %639 = vsyncadd [#allocation6], 4294963200  ;;  %v649_v0 = vmov 0   ;;  %v507_v1 = vld [vmem:[#allocation5 + $0x74] ss:$8 sps:$4 sm:$0xff]   ;;  %v536_v16 = vld [vmem:[#allocation7 + $0x68] sm:$0xff]   ;;  %v83_v34 = vlaneseq }
  0x29   :  { %211 = vmatprep.mubr.bf16.mxu0 %v649_v0  ;;  %v509_v2 = vld [vmem:[#allocation5 + $0x70] ss:$8 sps:$4 sm:$0xff]   ;;  %179 = vmatprep.subr.bf16.mxu0 %v507_v1  ;;  %v510_v3 = vld [vmem:[#allocation5 + $0x64] ss:$8 sps:$4 sm:$0xff]   ;;  %v512_v4 = vld [vmem:[#allocation5 + $0x60] ss:$8 sps:$4 sm:$0xff]  }
  0x2a   :  { %180 = vmatpush1.bf16.msra.mxu0 %v509_v2  ;;  %v513_v5 = vld [vmem:[#allocation5 + $0x54] ss:$8 sps:$4 sm:$0xff]   ;;  %v515_v6 = vld [vmem:[#allocation5 + $0x50] ss:$8 sps:$4 sm:$0xff]   ;;  %v516_v7 = vld [vmem:[#allocation5 + $0x44] ss:$8 sps:$4 sm:$0xff]  }
  0x2b   :  { %181 = vmatprep.subr.bf16.mxu0 %v510_v3  ;;  %v518_v8 = vld [vmem:[#allocation5 + $0x40] ss:$8 sps:$4 sm:$0xff]   ;;  %v519_v9 = vld [vmem:[#allocation5 + $0x34] ss:$8 sps:$4 sm:$0xff]   ;;  %v521_v11 = vld [vmem:[#allocation5 + $0x30] ss:$8 sps:$4 sm:$0xff]  }
  0x2c   :  { %v532_v10 = vld [vmem:[#allocation7 + $0x78] sm:$0xff]   ;;  %v522_v13 = vld [vmem:[#allocation5 + $0x24] ss:$8 sps:$4 sm:$0xff]   ;;  %v534_v14 = vld [vmem:[#allocation7 + $0x70] sm:$0xff]   ;;  %v84_v35 = vshrl.u32 %v83_v34, 7 }
  0x2d   :  { %v533_v12 = vld [vmem:[#allocation7 + $0x38] sm:$0xff]   ;;  %476 = vmatprep.subr.bf16.mxu1 %v532_v10  ;;  %v535_v15 = vld [vmem:[#allocation7 + $0x30] sm:$0xff]   ;;  %v524_v17 = vld [vmem:[#allocation5 + $0x20] ss:$8 sps:$4 sm:$0xff]  }
  0x2e   :  { %182 = vmatpush1.bf16.msra.mxu0 %v512_v4  ;;  %477 = vmatpush3.bf16.msra.mxu1 %v533_v12  ;;  %v525_v18 = vld [vmem:[#allocation5 + $0x14] ss:$8 sps:$4 sm:$0xff]   ;;  %v537_v19 = vld [vmem:[#allocation7 + $0x28] sm:$0xff]   ;;  %v538_v20 = vld [vmem:[#allocation7 + $0x60] sm:$0xff]   ;;  %v89_v36 = vsub.s32 1, %v84_v35  ;;  %v85_v37 = vsub.s32 0, %v84_v35 }
  0x2f   :  { %183 = vmatprep.subr.bf16.mxu0 %v513_v5  ;;  %478 = vmatprep.subr.bf16.mxu1 %v534_v14  ;;  %v527_v21 = vld [vmem:[#allocation5 + $0x10] ss:$8 sps:$4 sm:$0xff]   ;;  %v539_v22 = vld [vmem:[#allocation7 + $0x20] sm:$0xff]   ;;  %v544_v30 = vld [vmem:[#allocation7 + $0x48] sm:$0xff]  }
  0x30   :  { %v528_v23 = vld [vmem:[#allocation5 + $0x4] ss:$8 sps:$4 sm:$0xff]   ;;  %v540_v24 = vld [vmem:[#allocation7 + $0x58] sm:$0xff]   ;;  %v530_v25 = vld [vmem:[#allocation5] ss:$8 sps:$4 sm:$0xff]  }
  0x31   :  { %v541_v26 = vld [vmem:[#allocation7 + $0x18] sm:$0xff]   ;;  %v542_v28 = vld [vmem:[#allocation7 + $0x50] sm:$0xff]   ;;  %v545_v31 = vld [vmem:[#allocation7 + $0x8] sm:$0xff]  }
  0x32   :  { %184 = vmatpush1.bf16.msra.mxu0 %v515_v6  ;;  %479 = vmatpush3.bf16.msra.mxu1 %v535_v15  ;;  %v531_v27 = vld [vmem:[#allocation2] sm:$0xff]   ;;  %v543_v29 = vld [vmem:[#allocation7 + $0x10] sm:$0xff]   ;;  %v546_v32 = vld [vmem:[#allocation7 + $0x40] sm:$0xff]  }
  0x33   :  { %185 = vmatprep.subr.bf16.mxu0 %v516_v7  ;;  %480 = vmatprep.subr.bf16.mxu1 %v536_v16  ;;  %v547_v33 = vld [vmem:[#allocation7] sm:$0xff]   ;;  %v81_v38 = vld [vmem:[%s707_s2] sm:$0x3] }
  0x34   :  { %v90_v40 = vrot.slane %v81_v38, %v89_v36  ;;  %v86_v41 = vrot.slane %v81_v38, %v85_v37  ;;  %v459_v57 = vld [vmem:[%s709_s4] ss:$0 sm:$0xff]  ;;  %s650_s4 = smov [#allocation8]  }
  0x35   :  { %s429_s12 = sshll.u32 %s650_s4, 4  ;;  %s430_s12 = int_to_ptr.vmem [resolvable:$true] %s429_s12 }
  0x36   :  { %186 = vmatpush1.bf16.msra.mxu0 %v518_v8  ;;  %481 = vmatpush3.bf16.msra.mxu1 %v537_v19  ;;  %s616_s13 = scalar_lea.vmem %s430_s12, 256  ;;  %p621_p2 = scmp.lt.s32.totalorder %s430_s12, %s430_s12 }
  0x37   :  { %187 = vmatprep.subr.bf16.mxu0 %v519_v9  ;;  %482 = vmatprep.subr.bf16.mxu1 %v538_v20  ;;  %p617_p1 = scmp.ne.s32.totalorder %s430_s12, %s616_s13  ;;  %p622_p3 = scmp.lt.s32.totalorder %s616_s13, %s616_s13 }
  0x39   :  { %p623_p4 = por %p622_p3, %p621_p2 }
  0x3a   :  { %188 = vmatpush1.bf16.msra.mxu0 %v521_v11  ;;  %483 = vmatpush3.bf16.msra.mxu1 %v539_v22 }
  0x3b   :  { %189 = vmatprep.subr.bf16.mxu0 %v522_v13  ;;  %484 = vmatprep.subr.bf16.mxu1 %v540_v24  ;;  %p624_p5 = pnand %p623_p4, %p617_p1 }
  0x3e   :  { %190 = vmatpush1.bf16.msra.mxu0 %v524_v17  ;;  %485 = vmatpush3.bf16.msra.mxu1 %v541_v26 }
  0x3f   :  { %191 = vmatprep.subr.bf16.mxu0 %v525_v18  ;;  %486 = vmatprep.subr.bf16.mxu1 %v542_v28 }
  0x42   :  { %192 = vmatpush1.bf16.msra.mxu0 %v527_v21  ;;  %487 = vmatpush3.bf16.msra.mxu1 %v543_v29 }
  0x43   :  { %193 = vmatprep.subr.bf16.mxu0 %v528_v23  ;;  %488 = vmatprep.subr.bf16.mxu1 %v544_v30 }
  0x46   :  { %194 = vmatpush1.bf16.msra.mxu0 %v530_v25  ;;  %489 = vmatpush3.bf16.msra.mxu1 %v545_v31 }
  0x47   :  { %490 = vmatprep.subr.bf16.mxu1 %v546_v32 }
  0x49   :  { %212 = vmatmul.mubr.bf16.vlgmr.msra.gmra.mxu0 %v531_v27 }
  0x4a   :  { %491 = vmatpush3.bf16.msra.mxu1 %v547_v33 }
 0x109   :  { %v213_v39 = vpop.f32.mrf.mxu0 }
 0x10a   :  { %v214_v46 = vadd.f32 %v213_v39, %v86_v41 }
 0x10b   :  { %v215_v42 = vpop.f32.mrf.mxu0 }
 0x10c   :  { %v216_v44 = vadd.f32 %v215_v42, %v90_v40  ;;  %v222_v52 = vmax.f32 %v214_v46, 0.0 }
 0x10d   :  { %v217_v43 = vpop.f32.mrf.mxu0 }
 0x10e   :  { %v218_v45 = vadd.f32 %v217_v43, %v86_v41  ;;  %v223_v50 = vmax.f32 %v216_v44, 0.0 }
 0x10f   :  { %v219_v47 = vpop.f32.mrf.mxu0 }
 0x110   :  { %v220_v48 = vadd.f32 %v219_v47, %v90_v40  ;;  %v224_v49 = vmax.f32 %v218_v45, 0.0 }
 0x112   :  { %v225_v51 = vmax.f32 %v220_v48, 0.0  ;;  %v226_v54 = vpack.c.bf16 %v224_v49, %v222_v52 }
 0x114   :  { %v227_v53 = vpack.c.bf16 %v225_v51, %v223_v50 }
 0x116   :  { %395 = vmatprep.mubr.bf16.mxu1 %v227_v53 }
 0x117   :  { %396 = vmatmul.mubr.bf16.vlgmr.msra.gmra.mxu1 %v226_v54 }
 0x1d7   :  { %v492_v55 = vpop.f32.mrf.mxu1 }
 0x1d9   :  { %v493_v56 = vpop.f32.mrf.mxu1 }
 0x1da   :  { %v494_v58 = vadd.f32 %v493_v56, %v492_v55 }
 0x1db   :  { %v495_v59 = vpop.f32.mrf.mxu1 }
 0x1dc   :  { %v398_v60 = vadd.f32 %v494_v58, %v459_v57 }
 0x1dd   :  { %v496_v61 = vpop.f32.mrf.mxu1 }
 0x1de   :  { %v497_v62 = vadd.f32 %v496_v61, %v495_v59  ;;  %404 = vmax.xlane.f32.xlu0 %v398_v60 }
 0x1e0   :  { %v401_v63 = vadd.f32 %v497_v62, %v459_v57 }
 0x1e2   :  { %406 = vmax.xlane.f32.xlu0 %v401_v63 }
 0x267   :  { %v405_v0 = vpop.xlane.xlu0 %404 }
 0x268   :  { %v408_v1 = vsub.f32 %v398_v60, %v405_v0 }
 0x26a   :  { %v410_v2 = vmul.f32 1.442695, %v408_v1 }
 0x26b   :  { %v407_v3 = vpop.xlane.xlu0 %406 }
 0x26c   :  { %548 = vpow2.f32 %v410_v2  ;;  %v409_v4 = vsub.f32 %v401_v63, %v407_v3 }
 0x26e   :  { %v412_v5 = vmul.f32 1.442695, %v409_v4 }
 0x270   :  { %550 = vpow2.f32 %v412_v5 }
 0x279   :  { %v549_v6 = vpop.eup %548 }
 0x27a   :  { %414 = vadd.xlane.f32.xlu1 %v549_v6 }
 0x27d   :  { %v551_v7 = vpop.eup %550 }
 0x27e   :  { %416 = vadd.xlane.f32.xlu1 %v551_v7 }
 0x303   :  { %v415_v8 = vpop.xlane.xlu1 %414 }
 0x304   :  { %552 = vrcp.f32 %v415_v8 }
 0x307   :  { %v417_v9 = vpop.xlane.xlu1 %416 }
 0x308   :  { %554 = vrcp.f32 %v417_v9 }
 0x311   :  { %v553_v10 = vpop.eup %552 }
 0x312   :  { %v419_v11 = vmul.f32 %v553_v10, %v549_v6 }
 0x314   :  { %422 = vst [vmem:[#allocation8] sm:$0xff] %v419_v11 }
 0x315   :  { %v555_v12 = vpop.eup %554 }
 0x316   :  { %v421_v13 = vmul.f32 %v555_v12, %v551_v7 }
 0x318   :  { %423 = vst [vmem:[#allocation8 + $0x8] sm:$0xff] %v421_v13 }
 0x319   :  { %627 = shalt.err (!%p624_p5)
}
 0x31a   :  { %435 = dma.vmem_to_hbm [thread:$0]  %s430_s12, 256, %s710_s5, [#allocation4], %s643_s21, %s643_s21, %s644_s22  }
 0x31b   :  { %640 = dma.done.wait [#allocation4], 256  }
 0x31c   :  { %641 = vsyncadd [#allocation4], 4294967040 }
 0x31d   :  { %439 = vsyncpa [#allocation3], 1 }
 0x31e   :  { %440 = vsyncpa [#allocation6], 1 }
 0x31f   :  { %441 = vsyncpa [#allocation4], 1 }

</bundles_post_ra>
